<compile_context>
chip_gen: v7x
topology: tpu7x:2x2x1
jax: 0.10.0
libtpu: 0.0.40
codegen_flags: <defaults>
</compile_context>

<pallas_src>
import functools

import jax
import jax.numpy as jnp
from jax import lax
from jax.experimental import pallas as pl
from jax.experimental.pallas import tpu as pltpu

BN_EPS = 1e-5
NEG_SLOPE = 0.2
VMEM_LIMIT = 48 * 1024 * 1024          # safe on v5e/v6e (128 MiB) and v7x (64 MiB)
IN_BLOCK_BUDGET = 4 * 1024 * 1024      # per main input block (double buffered)
OUT_BLOCK_BUDGET = 4 * 1024 * 1024     # per output block (double buffered)


def _pick_row_tile(ho, wz, k4, wo, cout):
    """Largest output-row tile that divides Ho, keeps the pass-2 output block
    lane-legal (th == Ho, or th % 8 == 0 and (th*Wo) % 128 == 0) and fits the
    VMEM byte budget."""
    def legal(d):
        if ho % d:
            return False
        return d == ho or (d % 8 == 0 and (d * wo) % 128 == 0)

    cands = sorted((d for d in range(1, ho + 1) if legal(d)), reverse=True)
    for d in cands:
        if d * wz * k4 * 2 <= IN_BLOCK_BUDGET and d * wo * cout * 4 <= OUT_BLOCK_BUDGET:
            return d
    return cands[-1]   # smallest legal tile; may exceed budget for extreme shapes


# ----------------------------------------------------------------------------
# Shared in-kernel conv: 4 shifted matmuls over the 2x2 space-to-depth input.
#   zm_ref: (1, th, Wz, 4*Cin) bf16   -- z rows [t*th, t*th+th)
#   zh_ref: (1, 1,  Wz, 4*Cin) bf16   -- halo row t*th+th
#   w_ref : (4, 4*Cin, Cout)   bf16   -- per-(a,b) tap weights
# returns (th*Wo, Cout) f32 conv output for this tile.
# ----------------------------------------------------------------------------
def _conv_acc(zm_ref, zh_ref, w_ref, th, wo, k4):
    zm = zm_ref[0]                                   # (th, Wz, K4)
    zh = zh_ref[0]                                   # (1,  Wz, K4)
    z_ext = jnp.concatenate([zm, zh], axis=0)        # (th+1, Wz, K4)
    acc = None
    for p in range(4):                               # p = a*2 + b
        a, b = divmod(p, 2)
        zs = z_ext[a:a + th, b:b + wo, :].reshape(th * wo, k4)
        d = jnp.dot(zs, w_ref[p], preferred_element_type=jnp.float32)
        acc = d if acc is None else acc + d
    return acc                                       # (th*Wo, Cout) f32


# --------------- Pass 1: per-batch per-channel sum / sum-of-squares ----------
def _stats_kernel(zm_ref, zh_ref, w_ref, sum_ref, ssq_ref, *, th, wo, k4):
    acc = _conv_acc(zm_ref, zh_ref, w_ref, th, wo, k4)

    @pl.when(pl.program_id(1) == 0)       # first row-tile of this batch element
    def _():
        sum_ref[...] = jnp.zeros_like(sum_ref)
        ssq_ref[...] = jnp.zeros_like(ssq_ref)

    sum_ref[0] += jnp.sum(acc, axis=0, keepdims=True)
    ssq_ref[0] += jnp.sum(acc * acc, axis=0, keepdims=True)


# --------------- Pass 2: recompute conv, fused BN affine + LeakyReLU ---------
def _apply_kernel(zm_ref, zh_ref, w_ref, scale_ref, bias_ref, out_ref, *, th, wo, k4):
    acc = _conv_acc(zm_ref, zh_ref, w_ref, th, wo, k4)
    yn = acc * scale_ref[0] + bias_ref[0]                 # (th*Wo, Cout) f32
    y = jnp.where(yn >= 0, yn, NEG_SLOPE * yn)
    out_ref[0] = y.T.astype(out_ref.dtype)                # (Cout, th*Wo) NCHW-flat tile


@functools.partial(jax.jit, static_argnames=("stride",))
def cnn_block_forward(x, conv_w, gamma, beta, stride=2):
    """x: (N, Cin, H, W); conv_w: (Cout, Cin, 4, 4); gamma/beta: (Cout,)."""
    if stride != 2:
        raise NotImplementedError("Pallas CNNBlock implemented for stride=2 only.")

    n, cin, h, w = x.shape
    cout = conv_w.shape[0]
    assert h % 2 == 0 and w % 2 == 0, "even spatial dims required for k=4,s=2,p=1"
    ho, wo = h // 2, w // 2
    hz, wz = ho + 1, wo + 1
    k4 = 4 * cin
    m = n * ho * wo

    # ---- cheap wrapper-side layout prep (x-sized, not the 4x im2col) --------
    xp = jnp.pad(x, ((0, 0), (0, 0), (1, 1), (1, 1)), mode="reflect")
    xp = xp.transpose(0, 2, 3, 1)                                   # NHWC (N, Hp, Wp, Cin)
    z = xp.reshape(n, hz, 2, wz, 2, cin).transpose(0, 1, 3, 2, 4, 5)
    z = z.reshape(n, hz, wz, k4).astype(jnp.bfloat16)               # (N, Hz, Wz, 4*Cin)

    # per-(a,b) tap weights: wt[a*2+b][(dh*2+dw)*Cin + ci, co] = conv_w[co, ci, 2a+dh, 2b+dw]
    wt = conv_w.transpose(2, 3, 1, 0).reshape(2, 2, 2, 2, cin, cout)   # (a, dh, b, dw, ci, co)
    wt = wt.transpose(0, 2, 1, 3, 4, 5).reshape(4, k4, cout).astype(jnp.bfloat16)

    th = _pick_row_tile(ho, wz, k4, wo, cout)
    t = ho // th

    z_main_spec = pl.BlockSpec((1, th, wz, k4), lambda i, j: (i, j, 0, 0))
    z_halo_spec = pl.BlockSpec((1, 1, wz, k4), lambda i, j: (i, (j + 1) * th, 0, 0))
    w_spec = pl.BlockSpec((4, k4, cout), lambda i, j: (0, 0, 0))

    flops = 2 * m * (16 * cin) * cout

    # -------------------- pass 1: batch statistics ---------------------------
    sums, ssqs = pl.pallas_call(
        functools.partial(_stats_kernel, th=th, wo=wo, k4=k4),
        out_shape=(
            jax.ShapeDtypeStruct((n, 1, cout), jnp.float32),   # per-batch sum(y)
            jax.ShapeDtypeStruct((n, 1, cout), jnp.float32),   # per-batch sum(y*y)
        ),
        grid_spec=pltpu.PrefetchScalarGridSpec(
            num_scalar_prefetch=0,
            grid=(n, t),
            in_specs=[z_main_spec, z_halo_spec, w_spec],
            out_specs=[
                pl.BlockSpec((1, 1, cout), lambda i, j: (i, 0, 0)),
                pl.BlockSpec((1, 1, cout), lambda i, j: (i, 0, 0)),
            ],
        ),
        compiler_params=pltpu.CompilerParams(
            dimension_semantics=("parallel", "arbitrary"),   # per-batch partials: race-free
            vmem_limit_bytes=VMEM_LIMIT,
        ),
        cost_estimate=pl.CostEstimate(
            flops=flops, transcendentals=0,
            bytes_accessed=int(z.size * 2 + wt.size * 2 + 2 * n * cout * 4)),
    )(z, z, wt)

    # ---- BatchNorm2d training-mode batch stats folded to one affine (f32) ---
    inv_m = 1.0 / float(m)
    s1 = jnp.sum(sums, axis=0)                      # (1, Cout)
    s2 = jnp.sum(ssqs, axis=0)
    mean = s1 * inv_m
    var = jnp.maximum(s2 * inv_m - mean * mean, 0.0)
    scale = gamma.astype(jnp.float32).reshape(1, cout) * lax.rsqrt(var + BN_EPS)
    bias = beta.astype(jnp.float32).reshape(1, cout) - mean * scale
    scale3 = scale.reshape(1, 1, cout)
    bias3 = bias.reshape(1, 1, cout)

    # --------- pass 2: recompute conv, apply BN + LeakyReLU, NCHW-flat -------
    out_flat = pl.pallas_call(
        functools.partial(_apply_kernel, th=th, wo=wo, k4=k4),
        out_shape=jax.ShapeDtypeStruct((n, cout, ho * wo), jnp.float32),
        grid_spec=pltpu.PrefetchScalarGridSpec(
            num_scalar_prefetch=0,
            grid=(n, t),
            in_specs=[
                z_main_spec, z_halo_spec, w_spec,
                pl.BlockSpec((1, 1, cout), lambda i, j: (0, 0, 0)),
                pl.BlockSpec((1, 1, cout), lambda i, j: (0, 0, 0)),
            ],
            out_specs=pl.BlockSpec((1, cout, th * wo), lambda i, j: (i, 0, j)),
        ),
        compiler_params=pltpu.CompilerParams(
            dimension_semantics=("parallel", "parallel"),
            vmem_limit_bytes=VMEM_LIMIT,
        ),
        cost_estimate=pl.CostEstimate(
            flops=flops, transcendentals=0,
            bytes_accessed=int(z.size * 2 + wt.size * 2 + m * cout * 4)),
    )(z, z, wt, scale3, bias3)

    # metadata-only reshape to NCHW (no transpose pass)
    return out_flat.reshape(n, cout, ho, wo)


def _reference(x, conv_w, gamma, beta, stride=2):
    # Pure-JAX reference mirroring PyTorch semantics.
    x_pad = jnp.pad(x, ((0, 0), (0, 0), (1, 1), (1, 1)), mode="reflect")
    y = lax.conv_general_dilated(
        x_pad, conv_w, window_strides=(stride, stride), padding="VALID",
        dimension_numbers=("NCHW", "OIHW", "NCHW"),
        precision=lax.Precision.HIGHEST,
    )
    mean = y.mean(axis=(0, 2, 3), keepdims=True)
    var = ((y - mean) ** 2).mean(axis=(0, 2, 3), keepdims=True)
    yn = (y - mean) / jnp.sqrt(var + BN_EPS)
    yn = yn * gamma.reshape(1, -1, 1, 1) + beta.reshape(1, -1, 1, 1)
    return jnp.where(yn >= 0, yn, NEG_SLOPE * yn)


if __name__ == "__main__":
    key = jax.random.PRNGKey(0)
    k_x, k_w = jax.random.split(key)

    N, C_IN, H, W = 2, 4, 16, 16
    C_OUT, STRIDE = 8, 2

    x = jax.random.normal(k_x, (N, C_IN, H, W), dtype=jnp.float32)
    conv_w = 0.1 * jax.random.normal(k_w, (C_OUT, C_IN, 4, 4), dtype=jnp.float32)
    gamma = jnp.ones((C_OUT,), dtype=jnp.float32)   # BatchNorm2d weight default
    beta = jnp.zeros((C_OUT,), dtype=jnp.float32)   # BatchNorm2d bias default

    out = cnn_block_forward(x, conv_w, gamma, beta, stride=STRIDE)
    out = jax.block_until_ready(out)

    assert out.shape == (N, C_OUT, H // 2, W // 2), out.shape

    ref = jax.block_until_ready(_reference(x, conv_w, gamma, beta, stride=STRIDE))
    assert jnp.allclose(out, ref, atol=2e-2, rtol=2e-2), float(jnp.max(jnp.abs(out - ref)))

    print("KERNEL_OK")
</pallas_src>

<mosaic_0001>
module attributes {stable_mosaic.version = 11 : i64} {
  func.func @_stats_kernel(%arg0: i32, %arg1: i32, %arg2: memref<1x8x9x16xbf16, #tpu.memory_space<vmem>>, %arg3: memref<1x1x9x16xbf16, #tpu.memory_space<vmem>>, %arg4: memref<4x16x8xbf16, #tpu.memory_space<vmem>>, %arg5: memref<1x1x8xf32, #tpu.memory_space<vmem>>, %arg6: memref<1x1x8xf32, #tpu.memory_space<vmem>>) attributes {dimension_semantics = [#tpu.dimension_semantics<parallel>, #tpu.dimension_semantics<arbitrary>], iteration_bounds = array<i64: 2, 1>, scalar_prefetch = 0 : i64, scratch_operands = 0 : i64, tpu.core_type = #tpu.core_type<tc>, window_params = [{transform_indices = @transform_0, window_bounds = array<i64: 1, 8, 9, 16>}, {transform_indices = @transform_1, window_bounds = array<i64: 1, 1, 9, 16>}, {pipeline_mode = #tpu.pipeline_mode<synchronous>, transform_indices = @transform_2, window_bounds = array<i64: 4, 16, 8>}, {transform_indices = @transform_3, window_bounds = array<i64: 1, 1, 8>}, {transform_indices = @transform_4, window_bounds = array<i64: 1, 1, 8>}]} {
    %c0 = arith.constant 0 : index
    %c0_0 = arith.constant 0 : index
    %c0_1 = arith.constant 0 : index
    %c0_2 = arith.constant 0 : index
    %0 = vector.load %arg2[%c0, %c0_0, %c0_1, %c0_2] : memref<1x8x9x16xbf16, #tpu.memory_space<vmem>>, vector<1x8x9x16xbf16>
    %1 = vector.shape_cast %0 : vector<1x8x9x16xbf16> to vector<8x9x16xbf16>
    %c0_3 = arith.constant 0 : index
    %c0_4 = arith.constant 0 : index
    %c0_5 = arith.constant 0 : index
    %c0_6 = arith.constant 0 : index
    %2 = vector.load %arg3[%c0_3, %c0_4, %c0_5, %c0_6] : memref<1x1x9x16xbf16, #tpu.memory_space<vmem>>, vector<1x1x9x16xbf16>
    %3 = vector.shape_cast %2 : vector<1x1x9x16xbf16> to vector<1x9x16xbf16>
    %4 = tpu.concatenate %1, %3 in 0 : vector<8x9x16xbf16>, vector<1x9x16xbf16> -> vector<9x9x16xbf16>
    %5 = vector.extract_strided_slice %4 {offsets = [0, 0, 0], sizes = [8, 8, 16], strides = [1, 1, 1]} : vector<9x9x16xbf16> to vector<8x8x16xbf16>
    %6 = vector.shape_cast %5 : vector<8x8x16xbf16> to vector<64x16xbf16>
    %c0_7 = arith.constant 0 : index
    %c0_8 = arith.constant 0 : index
    %c0_9 = arith.constant 0 : index
    %7 = vector.load %arg4[%c0_7, %c0_8, %c0_9] : memref<4x16x8xbf16, #tpu.memory_space<vmem>>, vector<1x16x8xbf16>
    %8 = vector.shape_cast %7 : vector<1x16x8xbf16> to vector<16x8xbf16>
    %cst = arith.constant dense<0.000000e+00> : vector<64x8xf32>
    %9 = tpu.matmul %6, %8, %cst {dimension_numbers = #tpu.dot_dimension_numbers<[1], [0], [0], [1], [0, 0, 1, 1], [], []>} : vector<64x16xbf16>, vector<16x8xbf16>, vector<64x8xf32> -> vector<64x8xf32>
    %10 = vector.extract_strided_slice %4 {offsets = [0, 1, 0], sizes = [8, 8, 16], strides = [1, 1, 1]} : vector<9x9x16xbf16> to vector<8x8x16xbf16>
    %11 = vector.shape_cast %10 : vector<8x8x16xbf16> to vector<64x16xbf16>
    %c1 = arith.constant 1 : index
    %c0_10 = arith.constant 0 : index
    %c0_11 = arith.constant 0 : index
    %12 = vector.load %arg4[%c1, %c0_10, %c0_11] : memref<4x16x8xbf16, #tpu.memory_space<vmem>>, vector<1x16x8xbf16>
    %13 = vector.shape_cast %12 : vector<1x16x8xbf16> to vector<16x8xbf16>
    %cst_12 = arith.constant dense<0.000000e+00> : vector<64x8xf32>
    %14 = tpu.matmul %11, %13, %cst_12 {dimension_numbers = #tpu.dot_dimension_numbers<[1], [0], [0], [1], [0, 0, 1, 1], [], []>} : vector<64x16xbf16>, vector<16x8xbf16>, vector<64x8xf32> -> vector<64x8xf32>
    %15 = arith.addf %9, %14 : vector<64x8xf32>
    %16 = vector.extract_strided_slice %4 {offsets = [1, 0, 0], sizes = [8, 8, 16], strides = [1, 1, 1]} : vector<9x9x16xbf16> to vector<8x8x16xbf16>
    %17 = vector.shape_cast %16 : vector<8x8x16xbf16> to vector<64x16xbf16>
    %c2 = arith.constant 2 : index
    %c0_13 = arith.constant 0 : index
    %c0_14 = arith.constant 0 : index
    %18 = vector.load %arg4[%c2, %c0_13, %c0_14] : memref<4x16x8xbf16, #tpu.memory_space<vmem>>, vector<1x16x8xbf16>
    %19 = vector.shape_cast %18 : vector<1x16x8xbf16> to vector<16x8xbf16>
    %cst_15 = arith.constant dense<0.000000e+00> : vector<64x8xf32>
    %20 = tpu.matmul %17, %19, %cst_15 {dimension_numbers = #tpu.dot_dimension_numbers<[1], [0], [0], [1], [0, 0, 1, 1], [], []>} : vector<64x16xbf16>, vector<16x8xbf16>, vector<64x8xf32> -> vector<64x8xf32>
    %21 = arith.addf %15, %20 : vector<64x8xf32>
    %22 = vector.extract_strided_slice %4 {offsets = [1, 1, 0], sizes = [8, 8, 16], strides = [1, 1, 1]} : vector<9x9x16xbf16> to vector<8x8x16xbf16>
    %23 = vector.shape_cast %22 : vector<8x8x16xbf16> to vector<64x16xbf16>
    %c3 = arith.constant 3 : index
    %c0_16 = arith.constant 0 : index
    %c0_17 = arith.constant 0 : index
    %24 = vector.load %arg4[%c3, %c0_16, %c0_17] : memref<4x16x8xbf16, #tpu.memory_space<vmem>>, vector<1x16x8xbf16>
    %25 = vector.shape_cast %24 : vector<1x16x8xbf16> to vector<16x8xbf16>
    %cst_18 = arith.constant dense<0.000000e+00> : vector<64x8xf32>
    %26 = tpu.matmul %23, %25, %cst_18 {dimension_numbers = #tpu.dot_dimension_numbers<[1], [0], [0], [1], [0, 0, 1, 1], [], []>} : vector<64x16xbf16>, vector<16x8xbf16>, vector<64x8xf32> -> vector<64x8xf32>
    %27 = arith.addf %21, %26 : vector<64x8xf32>
    %c0_i32 = arith.constant 0 : i32
    %28 = arith.cmpi eq, %arg1, %c0_i32 : i32
    %29 = arith.extui %28 : i1 to i32
    %c0_i32_19 = arith.constant 0 : i32
    %30 = arith.cmpi ne, %29, %c0_i32_19 : i32
    scf.if %30 {
      %cst_34 = arith.constant 0.000000e+00 : f32
      %48 = vector.broadcast %cst_34 : f32 to vector<1x1x8xf32>
      %c0_35 = arith.constant 0 : index
      %c0_36 = arith.constant 0 : index
      %c0_37 = arith.constant 0 : index
      %49 = vector.load %arg5[%c0_35, %c0_36, %c0_37] : memref<1x1x8xf32, #tpu.memory_space<vmem>>, vector<1x1x8xf32>
      tpu.vector_store %arg5[%c0_35, %c0_36, %c0_37], %48 {strides = array<i32>} : memref<1x1x8xf32, #tpu.memory_space<vmem>>, vector<1x1x8xf32>,
      %cst_38 = arith.constant 0.000000e+00 : f32
      %50 = vector.broadcast %cst_38 : f32 to vector<1x1x8xf32>
      %c0_39 = arith.constant 0 : index
      %c0_40 = arith.constant 0 : index
      %c0_41 = arith.constant 0 : index
      %51 = vector.load %arg6[%c0_39, %c0_40, %c0_41] : memref<1x1x8xf32, #tpu.memory_space<vmem>>, vector<1x1x8xf32>
      tpu.vector_store %arg6[%c0_39, %c0_40, %c0_41], %50 {strides = array<i32>} : memref<1x1x8xf32, #tpu.memory_space<vmem>>, vector<1x1x8xf32>,
    } else {
    }
    %c0_20 = arith.constant 0 : index
    %c0_21 = arith.constant 0 : index
    %c0_22 = arith.constant 0 : index
    %31 = vector.load %arg5[%c0_20, %c0_21, %c0_22] : memref<1x1x8xf32, #tpu.memory_space<vmem>>, vector<1x1x8xf32>
    %32 = vector.shape_cast %31 : vector<1x1x8xf32> to vector<1x8xf32>
    %cst_23 = arith.constant dense<0.000000e+00> : vector<8xf32>
    %33 = vector.multi_reduction <add>, %27, %cst_23 [0] : vector<64x8xf32> to vector<8xf32>
    %34 = vector.shape_cast %33 : vector<8xf32> to vector<1x8xf32>
    %35 = arith.addf %32, %34 : vector<1x8xf32>
    %c0_24 = arith.constant 0 : index
    %c0_25 = arith.constant 0 : index
    %c0_26 = arith.constant 0 : index
    %36 = vector.load %arg5[%c0_24, %c0_25, %c0_26] : memref<1x1x8xf32, #tpu.memory_space<vmem>>, vector<1x1x8xf32>
    %37 = vector.shape_cast %36 : vector<1x1x8xf32> to vector<1x8xf32>
    %38 = vector.shape_cast %35 : vector<1x8xf32> to vector<1x1x8xf32>
    tpu.vector_store %arg5[%c0_24, %c0_25, %c0_26], %38 {strides = array<i32>} : memref<1x1x8xf32, #tpu.memory_space<vmem>>, vector<1x1x8xf32>,
    %c0_27 = arith.constant 0 : index
    %c0_28 = arith.constant 0 : index
    %c0_29 = arith.constant 0 : index
    %39 = vector.load %arg6[%c0_27, %c0_28, %c0_29] : memref<1x1x8xf32, #tpu.memory_space<vmem>>, vector<1x1x8xf32>
    %40 = vector.shape_cast %39 : vector<1x1x8xf32> to vector<1x8xf32>
    %41 = arith.mulf %27, %27 : vector<64x8xf32>
    %cst_30 = arith.constant dense<0.000000e+00> : vector<8xf32>
    %42 = vector.multi_reduction <add>, %41, %cst_30 [0] : vector<64x8xf32> to vector<8xf32>
    %43 = vector.shape_cast %42 : vector<8xf32> to vector<1x8xf32>
    %44 = arith.addf %40, %43 : vector<1x8xf32>
    %c0_31 = arith.constant 0 : index
    %c0_32 = arith.constant 0 : index
    %c0_33 = arith.constant 0 : index
    %45 = vector.load %arg6[%c0_31, %c0_32, %c0_33] : memref<1x1x8xf32, #tpu.memory_space<vmem>>, vector<1x1x8xf32>
    %46 = vector.shape_cast %45 : vector<1x1x8xf32> to vector<1x8xf32>
    %47 = vector.shape_cast %44 : vector<1x8xf32> to vector<1x1x8xf32>
    tpu.vector_store %arg6[%c0_31, %c0_32, %c0_33], %47 {strides = array<i32>} : memref<1x1x8xf32, #tpu.memory_space<vmem>>, vector<1x1x8xf32>,
    return
  }
  func.func @transform_0(%arg0: i32, %arg1: i32) -> (i32, i32, i32, i32) {
    %c0_i32 = arith.constant 0 : i32
    %c0_i32_0 = arith.constant 0 : i32
    %c0_i32_1 = arith.constant 0 : i32
    return %arg0, %arg1, %c0_i32, %c0_i32_0 : i32, i32, i32, i32
  }
  func.func @transform_1(%arg0: i32, %arg1: i32) -> (i32, i32, i32, i32) {
    %c1_i32 = arith.constant 1 : i32
    %0 = arith.addi %arg1, %c1_i32 : i32
    %c8_i32 = arith.constant 8 : i32
    %1 = arith.muli %0, %c8_i32 : i32
    %c0_i32 = arith.constant 0 : i32
    %c0_i32_0 = arith.constant 0 : i32
    %c0_i32_1 = arith.constant 0 : i32
    return %arg0, %1, %c0_i32, %c0_i32_0 : i32, i32, i32, i32
  }
  func.func @transform_2(%arg0: i32, %arg1: i32) -> (i32, i32, i32) {
    %c0_i32 = arith.constant 0 : i32
    %c0_i32_0 = arith.constant 0 : i32
    %c0_i32_1 = arith.constant 0 : i32
    %c0_i32_2 = arith.constant 0 : i32
    return %c0_i32, %c0_i32_0, %c0_i32_1 : i32, i32, i32
  }
  func.func @transform_3(%arg0: i32, %arg1: i32) -> (i32, i32, i32) {
    %c0_i32 = arith.constant 0 : i32
    %c0_i32_0 = arith.constant 0 : i32
    %c0_i32_1 = arith.constant 0 : i32
    return %arg0, %c0_i32, %c0_i32_0 : i32, i32, i32
  }
  func.func @transform_4(%arg0: i32, %arg1: i32) -> (i32, i32, i32) {
    %c0_i32 = arith.constant 0 : i32
    %c0_i32_0 = arith.constant 0 : i32
    %c0_i32_1 = arith.constant 0 : i32
    return %arg0, %c0_i32, %c0_i32_0 : i32, i32, i32
  }
}

module attributes {stable_mosaic.version = 11 : i64} {
  func.func @_apply_kernel(%arg0: i32, %arg1: i32, %arg2: memref<1x8x9x16xbf16, #tpu.memory_space<vmem>>, %arg3: memref<1x1x9x16xbf16, #tpu.memory_space<vmem>>, %arg4: memref<4x16x8xbf16, #tpu.memory_space<vmem>>, %arg5: memref<1x1x8xf32, #tpu.memory_space<vmem>>, %arg6: memref<1x1x8xf32, #tpu.memory_space<vmem>>, %arg7: memref<1x8x64xf32, #tpu.memory_space<vmem>>) attributes {dimension_semantics = [#tpu.dimension_semantics<parallel>, #tpu.dimension_semantics<parallel>], iteration_bounds = array<i64: 2, 1>, scalar_prefetch = 0 : i64, scratch_operands = 0 : i64, tpu.core_type = #tpu.core_type<tc>, window_params = [{transform_indices = @transform_0, window_bounds = array<i64: 1, 8, 9, 16>}, {transform_indices = @transform_1, window_bounds = array<i64: 1, 1, 9, 16>}, {pipeline_mode = #tpu.pipeline_mode<synchronous>, transform_indices = @transform_2, window_bounds = array<i64: 4, 16, 8>}, {pipeline_mode = #tpu.pipeline_mode<synchronous>, transform_indices = @transform_3, window_bounds = array<i64: 1, 1, 8>}, {pipeline_mode = #tpu.pipeline_mode<synchronous>, transform_indices = @transform_4, window_bounds = array<i64: 1, 1, 8>}, {transform_indices = @transform_5, window_bounds = array<i64: 1, 8, 64>}]} {
    %c0 = arith.constant 0 : index
    %c0_0 = arith.constant 0 : index
    %c0_1 = arith.constant 0 : index
    %c0_2 = arith.constant 0 : index
    %0 = vector.load %arg2[%c0, %c0_0, %c0_1, %c0_2] : memref<1x8x9x16xbf16, #tpu.memory_space<vmem>>, vector<1x8x9x16xbf16>
    %1 = vector.shape_cast %0 : vector<1x8x9x16xbf16> to vector<8x9x16xbf16>
    %c0_3 = arith.constant 0 : index
    %c0_4 = arith.constant 0 : index
    %c0_5 = arith.constant 0 : index
    %c0_6 = arith.constant 0 : index
    %2 = vector.load %arg3[%c0_3, %c0_4, %c0_5, %c0_6] : memref<1x1x9x16xbf16, #tpu.memory_space<vmem>>, vector<1x1x9x16xbf16>
    %3 = vector.shape_cast %2 : vector<1x1x9x16xbf16> to vector<1x9x16xbf16>
    %4 = tpu.concatenate %1, %3 in 0 : vector<8x9x16xbf16>, vector<1x9x16xbf16> -> vector<9x9x16xbf16>
    %5 = vector.extract_strided_slice %4 {offsets = [0, 0, 0], sizes = [8, 8, 16], strides = [1, 1, 1]} : vector<9x9x16xbf16> to vector<8x8x16xbf16>
    %6 = vector.shape_cast %5 : vector<8x8x16xbf16> to vector<64x16xbf16>
    %c0_7 = arith.constant 0 : index
    %c0_8 = arith.constant 0 : index
    %c0_9 = arith.constant 0 : index
    %7 = vector.load %arg4[%c0_7, %c0_8, %c0_9] : memref<4x16x8xbf16, #tpu.memory_space<vmem>>, vector<1x16x8xbf16>
    %8 = vector.shape_cast %7 : vector<1x16x8xbf16> to vector<16x8xbf16>
    %cst = arith.constant dense<0.000000e+00> : vector<64x8xf32>
    %9 = tpu.matmul %6, %8, %cst {dimension_numbers = #tpu.dot_dimension_numbers<[1], [0], [0], [1], [0, 0, 1, 1], [], []>} : vector<64x16xbf16>, vector<16x8xbf16>, vector<64x8xf32> -> vector<64x8xf32>
    %10 = vector.extract_strided_slice %4 {offsets = [0, 1, 0], sizes = [8, 8, 16], strides = [1, 1, 1]} : vector<9x9x16xbf16> to vector<8x8x16xbf16>
    %11 = vector.shape_cast %10 : vector<8x8x16xbf16> to vector<64x16xbf16>
    %c1 = arith.constant 1 : index
    %c0_10 = arith.constant 0 : index
    %c0_11 = arith.constant 0 : index
    %12 = vector.load %arg4[%c1, %c0_10, %c0_11] : memref<4x16x8xbf16, #tpu.memory_space<vmem>>, vector<1x16x8xbf16>
    %13 = vector.shape_cast %12 : vector<1x16x8xbf16> to vector<16x8xbf16>
    %cst_12 = arith.constant dense<0.000000e+00> : vector<64x8xf32>
    %14 = tpu.matmul %11, %13, %cst_12 {dimension_numbers = #tpu.dot_dimension_numbers<[1], [0], [0], [1], [0, 0, 1, 1], [], []>} : vector<64x16xbf16>, vector<16x8xbf16>, vector<64x8xf32> -> vector<64x8xf32>
    %15 = arith.addf %9, %14 : vector<64x8xf32>
    %16 = vector.extract_strided_slice %4 {offsets = [1, 0, 0], sizes = [8, 8, 16], strides = [1, 1, 1]} : vector<9x9x16xbf16> to vector<8x8x16xbf16>
    %17 = vector.shape_cast %16 : vector<8x8x16xbf16> to vector<64x16xbf16>
    %c2 = arith.constant 2 : index
    %c0_13 = arith.constant 0 : index
    %c0_14 = arith.constant 0 : index
    %18 = vector.load %arg4[%c2, %c0_13, %c0_14] : memref<4x16x8xbf16, #tpu.memory_space<vmem>>, vector<1x16x8xbf16>
    %19 = vector.shape_cast %18 : vector<1x16x8xbf16> to vector<16x8xbf16>
    %cst_15 = arith.constant dense<0.000000e+00> : vector<64x8xf32>
    %20 = tpu.matmul %17, %19, %cst_15 {dimension_numbers = #tpu.dot_dimension_numbers<[1], [0], [0], [1], [0, 0, 1, 1], [], []>} : vector<64x16xbf16>, vector<16x8xbf16>, vector<64x8xf32> -> vector<64x8xf32>
    %21 = arith.addf %15, %20 : vector<64x8xf32>
    %22 = vector.extract_strided_slice %4 {offsets = [1, 1, 0], sizes = [8, 8, 16], strides = [1, 1, 1]} : vector<9x9x16xbf16> to vector<8x8x16xbf16>
    %23 = vector.shape_cast %22 : vector<8x8x16xbf16> to vector<64x16xbf16>
    %c3 = arith.constant 3 : index
    %c0_16 = arith.constant 0 : index
    %c0_17 = arith.constant 0 : index
    %24 = vector.load %arg4[%c3, %c0_16, %c0_17] : memref<4x16x8xbf16, #tpu.memory_space<vmem>>, vector<1x16x8xbf16>
    %25 = vector.shape_cast %24 : vector<1x16x8xbf16> to vector<16x8xbf16>
    %cst_18 = arith.constant dense<0.000000e+00> : vector<64x8xf32>
    %26 = tpu.matmul %23, %25, %cst_18 {dimension_numbers = #tpu.dot_dimension_numbers<[1], [0], [0], [1], [0, 0, 1, 1], [], []>} : vector<64x16xbf16>, vector<16x8xbf16>, vector<64x8xf32> -> vector<64x8xf32>
    %27 = arith.addf %21, %26 : vector<64x8xf32>
    %c0_19 = arith.constant 0 : index
    %c0_20 = arith.constant 0 : index
    %c0_21 = arith.constant 0 : index
    %28 = vector.load %arg5[%c0_19, %c0_20, %c0_21] : memref<1x1x8xf32, #tpu.memory_space<vmem>>, vector<1x1x8xf32>
    %29 = vector.shape_cast %28 : vector<1x1x8xf32> to vector<1x8xf32>
    %30 = vector.broadcast %29 : vector<1x8xf32> to vector<64x8xf32>
    %31 = arith.mulf %27, %30 : vector<64x8xf32>
    %c0_22 = arith.constant 0 : index
    %c0_23 = arith.constant 0 : index
    %c0_24 = arith.constant 0 : index
    %32 = vector.load %arg6[%c0_22, %c0_23, %c0_24] : memref<1x1x8xf32, #tpu.memory_space<vmem>>, vector<1x1x8xf32>
    %33 = vector.shape_cast %32 : vector<1x1x8xf32> to vector<1x8xf32>
    %34 = vector.broadcast %33 : vector<1x8xf32> to vector<64x8xf32>
    %35 = arith.addf %31, %34 : vector<64x8xf32>
    %cst_25 = arith.constant 0.000000e+00 : f32
    %36 = vector.broadcast %cst_25 : f32 to vector<64x8xf32>
    %37 = arith.cmpf oge, %35, %36 : vector<64x8xf32>
    %cst_26 = arith.constant 2.000000e-01 : f32
    %38 = vector.broadcast %cst_26 : f32 to vector<64x8xf32>
    %39 = arith.mulf %38, %35 : vector<64x8xf32>
    %40 = arith.select %37, %35, %39 : vector<64x8xi1>, vector<64x8xf32>
    %41 = tpu.transpose %40, [1, 0] : vector<64x8xf32> -> vector<8x64xf32>
    %c0_27 = arith.constant 0 : index
    %c0_28 = arith.constant 0 : index
    %c0_29 = arith.constant 0 : index
    %42 = vector.load %arg7[%c0_27, %c0_28, %c0_29] : memref<1x8x64xf32, #tpu.memory_space<vmem>>, vector<1x8x64xf32>
    %43 = vector.shape_cast %42 : vector<1x8x64xf32> to vector<8x64xf32>
    %44 = vector.shape_cast %41 : vector<8x64xf32> to vector<1x8x64xf32>
    tpu.vector_store %arg7[%c0_27, %c0_28, %c0_29], %44 {strides = array<i32>} : memref<1x8x64xf32, #tpu.memory_space<vmem>>, vector<1x8x64xf32>,
    return
  }
  func.func @transform_0(%arg0: i32, %arg1: i32) -> (i32, i32, i32, i32) {
    %c0_i32 = arith.constant 0 : i32
    %c0_i32_0 = arith.constant 0 : i32
    %c0_i32_1 = arith.constant 0 : i32
    return %arg0, %arg1, %c0_i32, %c0_i32_0 : i32, i32, i32, i32
  }
  func.func @transform_1(%arg0: i32, %arg1: i32) -> (i32, i32, i32, i32) {
    %c1_i32 = arith.constant 1 : i32
    %0 = arith.addi %arg1, %c1_i32 : i32
    %c8_i32 = arith.constant 8 : i32
    %1 = arith.muli %0, %c8_i32 : i32
    %c0_i32 = arith.constant 0 : i32
    %c0_i32_0 = arith.constant 0 : i32
    %c0_i32_1 = arith.constant 0 : i32
    return %arg0, %1, %c0_i32, %c0_i32_0 : i32, i32, i32, i32
  }
  func.func @transform_2(%arg0: i32, %arg1: i32) -> (i32, i32, i32) {
    %c0_i32 = arith.constant 0 : i32
    %c0_i32_0 = arith.constant 0 : i32
    %c0_i32_1 = arith.constant 0 : i32
    %c0_i32_2 = arith.constant 0 : i32
    return %c0_i32, %c0_i32_0, %c0_i32_1 : i32, i32, i32
  }
  func.func @transform_3(%arg0: i32, %arg1: i32) -> (i32, i32, i32) {
    %c0_i32 = arith.constant 0 : i32
    %c0_i32_0 = arith.constant 0 : i32
    %c0_i32_1 = arith.constant 0 : i32
    %c0_i32_2 = arith.constant 0 : i32
    return %c0_i32, %c0_i32_0, %c0_i32_1 : i32, i32, i32
  }
  func.func @transform_4(%arg0: i32, %arg1: i32) -> (i32, i32, i32) {
    %c0_i32 = arith.constant 0 : i32
    %c0_i32_0 = arith.constant 0 : i32
    %c0_i32_1 = arith.constant 0 : i32
    %c0_i32_2 = arith.constant 0 : i32
    return %c0_i32, %c0_i32_0, %c0_i32_1 : i32, i32, i32
  }
  func.func @transform_5(%arg0: i32, %arg1: i32) -> (i32, i32, i32) {
    %c0_i32 = arith.constant 0 : i32
    %c0_i32_0 = arith.constant 0 : i32
    return %arg0, %c0_i32, %arg1 : i32, i32, i32
  }
}

</mosaic_0001>

<bundles_post_ra>
// kernel: cnn_block_forward.3
= control target key start
LH: loop header
LB: loop body
LE: loop exit
PB: predicated region body
PF: predicated region fallthrough
CT: control target
= control target key end

     0   :  { %s1308_s18 = smov 0   ;;  %s1310_s19 = smov 0   ;;  %s1487_s0 = inlined_call_operand.vmem [shape: bf16[2,9,9,16], index: 0, kind: input, shape index: {}, may-alias: {0,1}]   ;;  %s1488_s1 = inlined_call_operand.vmem [shape: bf16[2,9,9,16], index: 1, kind: input, shape index: {}, may-alias: {0,1}]   ;;  %s1489_s2 = inlined_call_operand.vmem [shape: bf16[4,16,8], index: 2, kind: input, shape index: {}]   ;;  %s1490_s3 = inlined_call_operand.vmem [shape: f32[1,1,8], index: 3, kind: input, shape index: {}]   ;;  %s1491_s4 = inlined_call_operand.vmem [shape: f32[1,1,8], index: 4, kind: input, shape index: {}]   ;;  %s1492_s5 = inlined_call_operand.vmem [shape: f32[2,8,64], index: 5, kind: output, shape index: {}]  }
   0x1   :  { %s1312_s20 = smov 0  }
   0x2 LB: > { %s27_s21 = sadd.s32 1, %s1272_s19  ;;  %p1079_p0 = scmp.ge.s32.totalorder %s1276_s20, 1  ;;  %s1276_s20 = sphi %s1312_s20, %s15_s20   ;;  %s1272_s19 = sphi %s1310_s19, %s1496_s19   ;;  %s1268_s18 = sphi %s1308_s18, %s1495_s18  }
   0x3   : > { %p29_p1 = scmp.ge.s32.totalorder %s27_s21, 2  ;;  %p243_p2 = scmp.lt.s32.totalorder %s1276_s20, 3 }
   0x5   : > { %s1498_s21 = smov (%p29_p1, %s27_s21), 0  ;;  %p244_p3 = pnand %p1079_p0, %p243_p2 }
   0x6   : > { %v1243_v0 = vld [vmem:[%s1489_s2 + $0x10] sm:$0xff] (!%p244_p3)   ;;  %p300_p4 = scmp.lt.s32.totalorder (!%p244_p3), %s1268_s18, 1  ;;  %v1247_v1 = vld [vmem:[%s1489_s2 + $0x8] sm:$0xff] (!%p244_p3)   ;;  %v1337_v2 = vld [vmem:[%s1489_s2] sm:$0xff] (!%p244_p3)   ;;  %vm492_vm0 = vcmask (!%p244_p3), 130048   ;;  %vm972_vm12 = vcmask (!%p244_p3), 523264  }
   0x7   : > { %247 = sbr.rel (%p244_p3) target bundleno = 406 (0x196), region = 40  ;;  %1171 = vmatprep.subr.bf16.mxu0 (!%p244_p3), %v1243_v0  ;;  %1151 = vmatprep.subr.bf16.mxu1 (!%p244_p3), %v1247_v1  ;;  %v1250_v3 = vld [vmem:[%s1489_s2 + $0x18] sm:$0xff] (!%p244_p3)   ;;  %vm356_vm1 = vsmask.f32 (!%p244_p3), 3328  ;;  %vm357_vm2 = vsmask.f32 (!%p244_p3), 7440 }
   0x8   : > { %1172 = vmatpush3.bf16.msra.mxu0 (!%p244_p3), %v1243_v0  ;;  %1152 = vmatpush3.bf16.msra.mxu1 (!%p244_p3), %v1247_v1  ;;  %vm1402_vm3 = vmor (!%p244_p3), %vm356_vm1, %vm357_vm2 }
   0x9   : > { %1161 = vmatprep.subr.bf16.mxu1 (!%p244_p3), %v1337_v2  ;;  %1181 = vmatprep.subr.bf16.mxu0 (!%p244_p3), %v1250_v3 }
   0xe   : > { %s1500_s18 = smov (!%p300_p4, %s1268_s18), 1 }
   0xf   : > { %s1215_s28 = smul.u32 72, %s1500_s18  ;;  %s1082_s17 = sshll.u32 %s1500_s18, 3 }
  0x10   : > { %s334_s24 = scalar_lea.vmem %s1492_s5, %s1082_s17 }
  0x11   : > { %s1349_s8 = scalar_lea.vmem %s1487_s0, %s1215_s28  ;;  %s1130_s9 = sadd.s32 64, %s1215_s28 }
  0x12   : > { %v1352_v4 = vld [vmem:[%s1349_s8 + $0x8] sm:$0xf]  ;;  %v1355_v5 = vld [vmem:[%s1349_s8 + $0x10] sm:$0xf]  ;;  %v1358_v6 = vld [vmem:[%s1349_s8 + $0x18] sm:$0xf]  ;;  %s325_s12 = scalar_lea.vmem %s1488_s1, %s1130_s9 }
  0x13   : > { %v388_v7 = vshrl.u32 %v1355_v5, 16  ;;  %v391_v8 = vshll.u32 %v1355_v5, 16  ;;  %v1363_v9 = vld [vmem:[%s1349_s8 + $0x20] sm:$0xf]  ;;  %v374_v10 = vshrl.u32 %v1352_v4, 16  ;;  %v377_v11 = vshll.u32 %v1352_v4, 16 }
  0x14   : > { %v1105_v12 = vcombine.low %v1352_v4, %v1355_v5  ;;  %v1370_v13 = vld [vmem:[%s1349_s8 + $0x28] sm:$0xf]  ;;  %v1373_v14 = vld [vmem:[%s1349_s8 + $0x30] sm:$0xf]  ;;  %v416_v17 = vshrl.u32 %v1363_v9, 16  ;;  %v1106_v18 = vcombine.low %v1358_v6, %v1363_v9  ;;  %v419_v20 = vshll.u32 %v1363_v9, 16 }
  0x15   : > { %v390_v15 = vrot.slane %v388_v7, 4  ;;  %v393_v16 = vrot.slane %v391_v8, 5  ;;  %v1379_v19 = vld [vmem:[%s1349_s8] sm:$0xf]  ;;  %v430_v21 = vshrl.u32 %v1370_v13, 16  ;;  %v433_v22 = vshll.u32 %v1370_v13, 16 }
  0x16   : > { %1173 = vmatprep.mubr.msk.bf16.mxu0 %vm492_vm0, %v1105_v12  ;;  %v1107_v23 = vcombine.low %v1370_v13, %v1373_v14  ;;  %v337_v24 = vld [vmem:[%s1349_s8 + $0x4] sm:$0x1]  ;;  %v444_v25 = vshrl.u32 %v1373_v14, 16  ;;  %v447_v26 = vshll.u32 %v1373_v14, 16  ;;  %v339_v27 = vld [vmem:[%s1349_s8 + $0xc] sm:$0x1]  ;;  %v1096_v40 = vcombine.low %v1363_v9, %v1370_v13 }
  0x17   : > { %1174 = vmatmul.mubr.msk.bf16.vlgmr.msra.gmra.mrb[0].mxu0 %vm492_vm0, %v1106_v18  ;;  %v341_v28 = vld [vmem:[%s1349_s8 + $0x14] sm:$0x1]  ;;  %v394_v29 = vor.u32 %v393_v16, %v390_v15  ;;  %v360_v30 = vshrl.u32 %v1379_v19, 16  ;;  %v363_v31 = vshll.u32 %v1379_v19, 16  ;;  %v369_v32 = vshll.u32 %v337_v24, 16 }
  0x18   : > { %1177 = vmatprep.mubr.msk.bf16.mxu0 %vm492_vm0, %v1107_v23  ;;  %v376_v33 = vrot.slane %v374_v10, 4  ;;  %1182 = vmatpush3.bf16.msra.mxu0 %v1250_v3  ;;  %v343_v34 = vld [vmem:[%s1349_s8 + $0x1c] sm:$0x1]  ;;  %v379_v35 = vrot.slane %v377_v11, 5  ;;  %v383_v36 = vshll.u32 %v339_v27, 16  ;;  %v397_v38 = vshll.u32 %v341_v28, 16 }
  0x19   : > { %v395_v37 = vrot.slane %v394_v29, 4  ;;  %v345_v39 = vld [vmem:[%s1349_s8 + $0x24] sm:$0x1]  ;;  %v362_v41 = vrot.slane %v360_v30, 4  ;;  %v365_v42 = vrot.slane %v363_v31, 5  ;;  %v371_v43 = vrot.slane %v369_v32, 5 }
  0x1a   : > { %v402_v44 = vshrl.u32 %v1358_v6, 16  ;;  %v380_v45 = vor.u32 %v379_v35, %v376_v33  ;;  %v385_v46 = vrot.slane %v383_v36, 5  ;;  %v399_v47 = vrot.slane %v397_v38, 5  ;;  %v1412_v49 = vld [vmem:[%s1349_s8 + $0x38] sm:$0xf] }
  0x1b   : > { %v405_v48 = vshll.u32 %v1358_v6, 16  ;;  %v366_v50 = vor.u32 %v365_v42, %v362_v41  ;;  %v411_v52 = vshll.u32 %v343_v34, 16  ;;  %v418_v53 = vrot.slane %v416_v17, 4  ;;  %v352_v58 = vld [vmem:[%s325_s12] sm:$0xf] }
  0x1c   : > { %v404_v51 = vrot.slane %v402_v44, 4  ;;  %v381_v54 = vrot.slane %v380_v45, 4  ;;  %v400_v55 = vsel %vm1402_vm3, %v395_v37, %v399_v47  ;;  %v421_v57 = vrot.slane %v419_v20, 5  ;;  %v353_v3 = vld [vmem:[%s325_s12 + $0x4] sm:$0x1] }
  0x1d   : > { %v407_v56 = vrot.slane %v405_v48, 5  ;;  %v367_v59 = vrot.slane %v366_v50, 4  ;;  %v413_v60 = vrot.slane %v411_v52, 5  ;;  %v425_v61 = vshll.u32 %v345_v39, 16  ;;  %v347_v15 = vld [vmem:[%s1349_s8 + $0x2c] sm:$0x1] }
  0x1e   : > { %v458_v62 = vshrl.u32 %v1412_v49, 16  ;;  %v386_v63 = vsel %vm1402_vm3, %v381_v54, %v385_v46  ;;  %v422_v1 = vor.u32 %v421_v57, %v418_v53  ;;  %v461_v7 = vshll.u32 %v1412_v49, 16  ;;  %v349_v33 = vld [vmem:[%s1349_s8 + $0x34] sm:$0x1]  ;;  %v351_v34 = vld [vmem:[%s1349_s8 + $0x3c] sm:$0x1] }
  0x1f   : > { %v408_v0 = vor.u32 %v407_v56, %v404_v51  ;;  %v372_v8 = vsel %vm1402_vm3, %v367_v59, %v371_v43  ;;  %v427_v10 = vrot.slane %v425_v61, 5  ;;  %v1116_v11 = vcombine.low %v386_v63, %v400_v55  ;;  %v1125_v9 = vld [vmem:[%s1490_s3] ss:$0 sm:$0xff] }
  0x20   : > { %v1108_v12 = vcombine.low %v1412_v49, %v352_v58  ;;  %v423_v17 = vrot.slane %v422_v1, 4  ;;  %v1085_v18 = vcombine.low %v372_v8, %v386_v63  ;;  %v774_v20 = vshrl.u32 %v352_v58, 16 }
  0x21   : > { %v409_v16 = vrot.slane %v408_v0, 4  ;;  %v777_v23 = vshll.u32 %v352_v58, 16  ;;  %v783_v24 = vshll.u32 %v353_v3, 16  ;;  %v432_v27 = vrot.slane %v430_v21, 4 }
  0x22   : > { %1178 = vmatmul.mubr.msk.bf16.gmra.mrb[4].mxu0 %vm492_vm0, %v1108_v12  ;;  %v435_v28 = vrot.slane %v433_v22, 5  ;;  %v428_v30 = vsel %vm1402_vm3, %v423_v17, %v427_v10  ;;  %1153 = vmatprep.mubr.msk.bf16.mxu1 %vm492_vm0, %v1085_v18  ;;  %v776_v31 = vrot.slane %v774_v20, 4  ;;  %v439_v32 = vshll.u32 %v347_v15, 16 }
  0x23   : > { %v414_v29 = vsel %vm1402_vm3, %v409_v16, %v413_v60  ;;  %1183 = vmatprep.mubr.msk.bf16.mxu0 %vm492_vm0, %v1116_v11  ;;  %v779_v21 = vrot.slane %v777_v23, 5  ;;  %v446_v22 = vrot.slane %v444_v25, 4  ;;  %v449_v39 = vrot.slane %v447_v26, 5 }
  0x24   : > { %v1086_v35 = vcombine.low %v400_v55, %v414_v29  ;;  %v1117_v36 = vcombine.low %v414_v29, %v428_v30  ;;  %v436_v37 = vor.u32 %v435_v28, %v432_v27  ;;  %v441_v38 = vrot.slane %v439_v32, 5 }
  0x25   : > { %v453_v41 = vshll.u32 %v349_v33, 16  ;;  %v460_v42 = vrot.slane %v458_v62, 4  ;;  %v463_v43 = vrot.slane %v461_v7, 5  ;;  %v467_v44 = vshll.u32 %v351_v34, 16 }
  0x26   : > { %1154 = vmatmul.mubr.msk.bf16.vlgmr.msra.gmra.mrb[0].mxu1 %vm492_vm0, %v1086_v35  ;;  %v785_v45 = vrot.slane %v783_v24, 5  ;;  %v437_v46 = vrot.slane %v436_v37, 4  ;;  %v450_v47 = vor.u32 %v449_v39, %v446_v22  ;;  %v780_v48 = vor.u32 %v779_v21, %v776_v31 }
  0x27   : > { %1162 = vmatpush3.bf16.msra.mxu1 %v1337_v2  ;;  %v455_v50 = vrot.slane %v453_v41, 5  ;;  %v464_v51 = vor.u32 %v463_v43, %v460_v42  ;;  %v469_v52 = vrot.slane %v467_v44, 5  ;;  %v1094_v59 = vcombine.low %v1379_v19, %v1352_v4 }
  0x28   : > { %v442_v25 = vsel %vm1402_vm3, %v437_v46, %v441_v38  ;;  %v451_v53 = vrot.slane %v450_v47, 4  ;;  %v781_v26 = vrot.slane %v780_v48, 4  ;;  %v1095_v62 = vcombine.low %v1355_v5, %v1358_v6 }
  0x29   : > { %v1087_v54 = vcombine.low %v428_v30, %v442_v25  ;;  %v465_v55 = vrot.slane %v464_v51, 4  ;;  %v1097_v4 = vcombine.low %v1373_v14, %v1412_v49  ;;  %v1126_v14 = vld [vmem:[%s1491_s4] ss:$0 sm:$0xff] }
  0x2a   : > { %1184 = vmatmul.mubr.msk.bf16.vlgmr.msra.gmra.mrb[0].mxu0 %vm492_vm0, %v1117_v36  ;;  %v456_v56 = vsel %vm1402_vm3, %v451_v53, %v455_v50  ;;  %v786_v2 = vsel %vm1402_vm3, %v781_v26, %v785_v45 }
  0x2b   : > { %1157 = vmatprep.mubr.msk.bf16.mxu1 %vm492_vm0, %v1087_v54  ;;  %v470_v57 = vsel %vm1402_vm3, %v465_v55, %v469_v52  ;;  %v1118_v58 = vcombine.low %v442_v25, %v456_v56 }
  0x2c   : > { %v1088_v60 = vcombine.low %v456_v56, %v470_v57  ;;  %v1119_v61 = vcombine.low %v470_v57, %v786_v2 }
  0x2d   : > { %1187 = vmatprep.mubr.msk.bf16.mxu0 %vm492_vm0, %v1118_v58 }
  0x2e   : > { %1158 = vmatmul.mubr.msk.bf16.gmra.mrb[4].mxu1 %vm492_vm0, %v1088_v60 }
  0x2f   : > { %1163 = vmatprep.mubr.msk.bf16.mxu1 %vm492_vm0, %v1094_v59 }
  0x32   : > { %1188 = vmatmul.mubr.msk.bf16.gmra.mrb[4].mxu0 %vm492_vm0, %v1119_v61 }
  0x36   : > { %1164 = vmatmul.mubr.msk.bf16.vlgmr.msra.gmra.mrb[0].mxu1 %vm492_vm0, %v1095_v62 }
  0x37   : > { %1167 = vmatprep.mubr.msk.bf16.mxu1 %vm492_vm0, %v1096_v40 }
  0x3e   : > { %1168 = vmatmul.mubr.msk.bf16.gmra.mrb[4].mxu1 %vm492_vm0, %v1097_v4 }
  0xfd   : > { %v1185_v19 = vpop.f32.mrb[0].mxu0 }
  0xfe   : > { %v847_v63 = vpop.f32.mrb[1].mxu0 }
  0xff   : > { %v1186_v0 = vpop.f32.mrb[2].mxu0 }
 0x100   : > { %v850_v1 = vpop.f32.mrb[3].mxu0 }
 0x105   : > { %v1189_v3 = vpop.f32.mrb[4].mxu0 }
 0x106   : > { %v863_v7 = vpop.f32.mrb[5].mxu0 }
 0x107   : > { %v1190_v8 = vpop.f32.mrb[6].mxu0 }
 0x108   : > { %v866_v5 = vpop.f32.mrb[7].mxu0 }
 0x109   : > { %v1165_v6 = vpop.f32.mrb[0].mxu1 }
 0x10a   : > { %v1191_v10 = vadd.f32 %v1185_v19, %v1165_v6  ;;  %v642_v13 = vpop.f32.mrb[1].mxu1 }
 0x10b   : > { %v1192_v11 = vadd.f32 %v847_v63, %v642_v13  ;;  %v1166_v12 = vpop.f32.mrb[2].mxu1 }
 0x10c   : > { %v1193_v49 = vadd.f32 %v1186_v0, %v1166_v12  ;;  %v645_v15 = vpop.f32.mrb[3].mxu1  ;;  %v895_v18 = vmul.f32 %v1191_v10, %v1125_v9 }
 0x10d   : > { %v893_v16 = vmul.f32 %v1192_v11, %v1125_v9  ;;  %v1194_v17 = vadd.f32 %v850_v1, %v645_v15 }
 0x10e   : > { %v910_v29 = vadd.f32 %v1126_v14, %v895_v18  ;;  %v896_v32 = vmul.f32 %v1193_v49, %v1125_v9 }
 0x10f   : > { %v894_v20 = vmul.f32 %v1194_v17, %v1125_v9  ;;  %v908_v23 = vadd.f32 %v1126_v14, %v893_v16 }
 0x110   : > { %v911_v22 = vadd.f32 %v1126_v14, %v896_v32  ;;  %v926_v42 = vmul.f32 0.2, %v910_v29  ;;  %vm918_vm6 = vcmp.ge.f32.partialorder %v910_v29, 0.0 }
 0x111   : > { %v909_v24 = vadd.f32 %v1126_v14, %v894_v20  ;;  %v1169_v27 = vpop.f32.mrb[4].mxu1  ;;  %vm916_vm4 = vcmp.ge.f32.partialorder %v908_v23, 0.0  ;;  %v924_v28 = vmul.f32 0.2, %v908_v23 }
 0x112   : > { %v1195_v30 = vadd.f32 %v1189_v3, %v1169_v27  ;;  %v658_v31 = vpop.f32.mrb[5].mxu1  ;;  %v934_v45 = vsel %vm918_vm6, %v910_v29, %v926_v42  ;;  %v927_v46 = vmul.f32 0.2, %v911_v22  ;;  %vm919_vm7 = vcmp.ge.f32.partialorder %v911_v22, 0.0 }
 0x113   : > { %v1196_v33 = vadd.f32 %v863_v7, %v658_v31  ;;  %v1170_v34 = vpop.f32.mrb[6].mxu1  ;;  %v932_v35 = vsel %vm916_vm4, %v908_v23, %v924_v28  ;;  %v925_v36 = vmul.f32 0.2, %v909_v24  ;;  %vm917_vm5 = vcmp.ge.f32.partialorder %v909_v24, 0.0 }
 0x114   : > { %v1197_v21 = vadd.f32 %v1190_v8, %v1170_v34  ;;  %940 = vxpose.xlu0.b32.start [1/8] (short) (narrow) %v932_v35, 8  ;;  %v661_v37 = vpop.f32.mrb[7].mxu1  ;;  %v899_v47 = vmul.f32 %v1195_v30, %v1125_v9  ;;  %v935_v50 = vsel %vm919_vm7, %v911_v22, %v927_v46 }
 0x115   : > { %v1198_v38 = vadd.f32 %v866_v5, %v661_v37  ;;  %v897_v39 = vmul.f32 %v1196_v33, %v1125_v9  ;;  %v933_v41 = vsel %vm917_vm5, %v909_v24, %v925_v36 }
 0x116   : > { %v914_v52 = vadd.f32 %v1126_v14, %v899_v47  ;;  %v900_v25 = vmul.f32 %v1197_v21, %v1125_v9 }
 0x117   : > { %v912_v43 = vadd.f32 %v1126_v14, %v897_v39  ;;  %v898_v44 = vmul.f32 %v1198_v38, %v1125_v9 }
 0x118   : > { %941 = vxpose.xlu0.b32.cont [2/8] (short) (narrow) %v933_v41, 8  ;;  %v915_v54 = vadd.f32 %v1126_v14, %v900_v25  ;;  %v930_v56 = vmul.f32 0.2, %v914_v52  ;;  %vm922_vm10 = vcmp.ge.f32.partialorder %v914_v52, 0.0 }
 0x119   : > { %v913_v48 = vadd.f32 %v1126_v14, %v898_v44  ;;  %v928_v51 = vmul.f32 0.2, %v912_v43  ;;  %vm920_vm8 = vcmp.ge.f32.partialorder %v912_v43, 0.0 }
 0x11a   : > { %v938_v2 = vsel %vm922_vm10, %v914_v52, %v930_v56  ;;  %v931_v57 = vmul.f32 0.2, %v915_v54  ;;  %vm923_vm11 = vcmp.ge.f32.partialorder %v915_v54, 0.0 }
 0x11b   : > { %v936_v53 = vsel %vm920_vm8, %v912_v43, %v928_v51  ;;  %v929_v26 = vmul.f32 0.2, %v913_v48  ;;  %vm921_vm9 = vcmp.ge.f32.partialorder %v913_v48, 0.0 }
 0x11c   : > { %942 = vxpose.xlu0.b32.cont [3/8] (short) (narrow) %v934_v45, 8  ;;  %v939_v58 = vsel %vm923_vm11, %v915_v54, %v931_v57 }
 0x11d   : > { %v937_v55 = vsel %vm921_vm9, %v913_v48, %v929_v26 }
 0x120   : > { %943 = vxpose.xlu0.b32.cont [4/8] (short) (narrow) %v935_v50, 8 }
 0x124   : > { %944 = vxpose.xlu0.b32.cont [5/8] (short) (narrow) %v936_v53, 8 }
 0x128   : > { %945 = vxpose.xlu0.b32.cont [6/8] (short) (narrow) %v937_v55, 8 }
 0x12c   : > { %946 = vxpose.xlu0.b32.cont [7/8] (short) (narrow) %v938_v2, 8 }
 0x130   : > { %947 = vxpose.xlu0.b32.end [8/8] (short) (narrow) %v939_v58, 8 }
 0x194   : > { %v956_v59 = vpop.trf.xlu0 }
 0x195   : > { %973 = vst.msk [vmem:[%s334_s24] sm:$0xff] %vm972_vm12, %v956_v59 }
 0x196 PF: > { %s15_s20 = sadd.s32 1, %s1276_s20   ;;  %s1495_s18 = smov %s1272_s19 }
 0x197   : > { %p12_p5 = scmp.ge.s32.totalorder %s15_s20, 4   ;;  %s1496_s19 = smov %s1498_s21 }
 0x199   :  { %14 = sbr.rel (!%p12_p5) target bundleno = 2 (0x2), region = 76 }

// kernel: cnn_block_forward.2
= control target key start
LH: loop header
LB: loop body
LE: loop exit
PB: predicated region body
PF: predicated region fallthrough
CT: control target
= control target key end

     0   :  { %s1259_s15 = smov 0   ;;  %s1261_s16 = smov 0   ;;  %s1466_s0 = inlined_call_operand.vmem [shape: bf16[2,9,9,16], index: 0, kind: input, shape index: {}, may-alias: {0,1}]   ;;  %s1467_s1 = inlined_call_operand.vmem [shape: bf16[2,9,9,16], index: 1, kind: input, shape index: {}, may-alias: {0,1}]   ;;  %s1468_s2 = inlined_call_operand.vmem [shape: bf16[4,16,8], index: 2, kind: input, shape index: {}]   ;;  %s1469_s3 = inlined_call_operand.vmem [shape: f32[2,1,8], index: 3, kind: output, shape index: {0}]   ;;  %s1470_s4 = inlined_call_operand.vmem [shape: f32[2,1,8], index: 4, kind: output, shape index: {1}]  }
   0x1   :  { %s1263_s17 = smov 0  }
   0x2 LB: > { %s27_s18 = sadd.s32 1, %s1227_s16  ;;  %p1037_p0 = scmp.ge.s32.totalorder %s1231_s17, 1  ;;  %s1231_s17 = sphi %s1263_s17, %s15_s17   ;;  %s1227_s16 = sphi %s1261_s16, %s1474_s16   ;;  %s1223_s15 = sphi %s1259_s15, %s1473_s15  }
   0x3   : > { %p29_p1 = scmp.ge.s32.totalorder %s27_s18, 2  ;;  %p219_p2 = scmp.lt.s32.totalorder %s1231_s17, 3 }
   0x5   : > { %s1476_s18 = smov (%p29_p1, %s27_s18), 0  ;;  %p220_p3 = pnand %p1037_p0, %p219_p2 }
   0x6   : > { %v1198_v0 = vld [vmem:[%s1468_s2 + $0x10] sm:$0xff] (!%p220_p3)   ;;  %p273_p4 = scmp.lt.s32.totalorder (!%p220_p3), %s1223_s15, 1  ;;  %v1202_v1 = vld [vmem:[%s1468_s2 + $0x8] sm:$0xff] (!%p220_p3)   ;;  %v1288_v2 = vld [vmem:[%s1468_s2] sm:$0xff] (!%p220_p3)   ;;  %vm464_vm0 = vcmask (!%p220_p3), 130048   ;;  %vm862_vm4 = vcmask (!%p220_p3), 57344  }
   0x7   : > { %223 = sbr.rel (%p220_p3) target bundleno = 303 (0x12f), region = 32  ;;  %1126 = vmatprep.subr.bf16.mxu0 (!%p220_p3), %v1198_v0  ;;  %1106 = vmatprep.subr.bf16.mxu1 (!%p220_p3), %v1202_v1  ;;  %v1205_v3 = vld [vmem:[%s1468_s2 + $0x18] sm:$0xff] (!%p220_p3)   ;;  %vm328_vm1 = vsmask.f32 (!%p220_p3), 3328  ;;  %vm329_vm2 = vsmask.f32 (!%p220_p3), 7440 }
   0x8   : > { %1127 = vmatpush3.bf16.msra.mxu0 (!%p220_p3), %v1198_v0  ;;  %1107 = vmatpush3.bf16.msra.mxu1 (!%p220_p3), %v1202_v1  ;;  %vm1353_vm3 = vmor (!%p220_p3), %vm328_vm1, %vm329_vm2  ;;  %vm866_vm5 = vcmask (!%p220_p3), 64512  }
   0x9   : > { %1116 = vmatprep.subr.bf16.mxu1 (!%p220_p3), %v1288_v2  ;;  %1136 = vmatprep.subr.bf16.mxu0 (!%p220_p3), %v1205_v3 }
   0xe   : > { %s1478_s15 = smov (!%p273_p4, %s1223_s15), 1 }
   0xf   : > { %s1170_s25 = smul.u32 72, %s1478_s15  ;;  %s1423_s11 = scalar_lea.vmem %s1469_s3, %s1478_s15 }
  0x10   : > { %s1429_s14 = scalar_lea.vmem %s1470_s4, %s1478_s15 }
  0x11   : > { %s1300_s30 = scalar_lea.vmem %s1466_s0, %s1170_s25  ;;  %s1085_s5 = sadd.s32 64, %s1170_s25 }
  0x12   : > { %v1303_v4 = vld [vmem:[%s1300_s30 + $0x8] sm:$0xf]  ;;  %v1306_v5 = vld [vmem:[%s1300_s30 + $0x10] sm:$0xf]  ;;  %v1309_v6 = vld [vmem:[%s1300_s30 + $0x18] sm:$0xf]  ;;  %s298_s8 = scalar_lea.vmem %s1467_s1, %s1085_s5 }
  0x13   : > { %v360_v7 = vshrl.u32 %v1306_v5, 16  ;;  %v363_v8 = vshll.u32 %v1306_v5, 16  ;;  %v1314_v9 = vld [vmem:[%s1300_s30 + $0x20] sm:$0xf]  ;;  %v346_v10 = vshrl.u32 %v1303_v4, 16  ;;  %v349_v11 = vshll.u32 %v1303_v4, 16 }
  0x14   : > { %v1062_v12 = vcombine.low %v1303_v4, %v1306_v5  ;;  %v1321_v13 = vld [vmem:[%s1300_s30 + $0x28] sm:$0xf]  ;;  %v1324_v14 = vld [vmem:[%s1300_s30 + $0x30] sm:$0xf]  ;;  %v388_v17 = vshrl.u32 %v1314_v9, 16  ;;  %v1063_v18 = vcombine.low %v1309_v6, %v1314_v9  ;;  %v391_v20 = vshll.u32 %v1314_v9, 16 }
  0x15   : > { %v362_v15 = vrot.slane %v360_v7, 4  ;;  %v365_v16 = vrot.slane %v363_v8, 5  ;;  %v1330_v19 = vld [vmem:[%s1300_s30] sm:$0xf]  ;;  %v402_v21 = vshrl.u32 %v1321_v13, 16  ;;  %v405_v22 = vshll.u32 %v1321_v13, 16 }
  0x16   : > { %1128 = vmatprep.mubr.msk.bf16.mxu0 %vm464_vm0, %v1062_v12  ;;  %v1064_v23 = vcombine.low %v1321_v13, %v1324_v14  ;;  %v309_v24 = vld [vmem:[%s1300_s30 + $0x4] sm:$0x1]  ;;  %v416_v25 = vshrl.u32 %v1324_v14, 16  ;;  %v419_v26 = vshll.u32 %v1324_v14, 16  ;;  %v311_v27 = vld [vmem:[%s1300_s30 + $0xc] sm:$0x1]  ;;  %v1052_v40 = vcombine.low %v1306_v5, %v1309_v6 }
  0x17   : > { %1129 = vmatmul.mubr.msk.bf16.vlgmr.msra.gmra.mrb[0].mxu0 %vm464_vm0, %v1063_v18  ;;  %v313_v28 = vld [vmem:[%s1300_s30 + $0x14] sm:$0x1]  ;;  %v366_v29 = vor.u32 %v365_v16, %v362_v15  ;;  %v332_v30 = vshrl.u32 %v1330_v19, 16  ;;  %v335_v31 = vshll.u32 %v1330_v19, 16  ;;  %v341_v32 = vshll.u32 %v309_v24, 16 }
  0x18   : > { %1132 = vmatprep.mubr.msk.bf16.mxu0 %vm464_vm0, %v1064_v23  ;;  %v348_v33 = vrot.slane %v346_v10, 4  ;;  %1137 = vmatpush3.bf16.msra.mxu0 %v1205_v3  ;;  %v315_v34 = vld [vmem:[%s1300_s30 + $0x1c] sm:$0x1]  ;;  %v351_v35 = vrot.slane %v349_v11, 5  ;;  %v355_v36 = vshll.u32 %v311_v27, 16  ;;  %v369_v38 = vshll.u32 %v313_v28, 16 }
  0x19   : > { %v367_v37 = vrot.slane %v366_v29, 4  ;;  %v317_v39 = vld [vmem:[%s1300_s30 + $0x24] sm:$0x1]  ;;  %v334_v41 = vrot.slane %v332_v30, 4  ;;  %v337_v42 = vrot.slane %v335_v31, 5  ;;  %v343_v43 = vrot.slane %v341_v32, 5 }
  0x1a   : > { %v374_v44 = vshrl.u32 %v1309_v6, 16  ;;  %v352_v45 = vor.u32 %v351_v35, %v348_v33  ;;  %v357_v46 = vrot.slane %v355_v36, 5  ;;  %v371_v47 = vrot.slane %v369_v38, 5  ;;  %v1363_v49 = vld [vmem:[%s1300_s30 + $0x38] sm:$0xf] }
  0x1b   : > { %v377_v48 = vshll.u32 %v1309_v6, 16  ;;  %v338_v50 = vor.u32 %v337_v42, %v334_v41  ;;  %v383_v52 = vshll.u32 %v315_v34, 16  ;;  %v390_v53 = vrot.slane %v388_v17, 4  ;;  %v324_v58 = vld [vmem:[%s298_s8] sm:$0xf] }
  0x1c   : > { %v376_v51 = vrot.slane %v374_v44, 4  ;;  %v353_v54 = vrot.slane %v352_v45, 4  ;;  %v372_v55 = vsel %vm1353_vm3, %v367_v37, %v371_v47  ;;  %v393_v57 = vrot.slane %v391_v20, 5  ;;  %v325_v3 = vld [vmem:[%s298_s8 + $0x4] sm:$0x1] }
  0x1d   : > { %v379_v56 = vrot.slane %v377_v48, 5  ;;  %v339_v59 = vrot.slane %v338_v50, 4  ;;  %v385_v60 = vrot.slane %v383_v52, 5  ;;  %v397_v61 = vshll.u32 %v317_v39, 16  ;;  %v319_v15 = vld [vmem:[%s1300_s30 + $0x2c] sm:$0x1] }
  0x1e   : > { %v430_v62 = vshrl.u32 %v1363_v49, 16  ;;  %v358_v63 = vsel %vm1353_vm3, %v353_v54, %v357_v46  ;;  %v394_v1 = vor.u32 %v393_v57, %v390_v53  ;;  %v433_v7 = vshll.u32 %v1363_v49, 16  ;;  %v321_v33 = vld [vmem:[%s1300_s30 + $0x34] sm:$0x1]  ;;  %v323_v34 = vld [vmem:[%s1300_s30 + $0x3c] sm:$0x1] }
  0x1f   : > { %v380_v0 = vor.u32 %v379_v56, %v376_v51  ;;  %v344_v8 = vsel %vm1353_vm3, %v339_v59, %v343_v43  ;;  %v399_v10 = vrot.slane %v397_v61, 5  ;;  %v1073_v11 = vcombine.low %v358_v63, %v372_v55 }
  0x20   : > { %v1065_v12 = vcombine.low %v1363_v49, %v324_v58  ;;  %v395_v17 = vrot.slane %v394_v1, 4  ;;  %v1042_v18 = vcombine.low %v344_v8, %v358_v63  ;;  %v746_v20 = vshrl.u32 %v324_v58, 16 }
  0x21   : > { %v381_v16 = vrot.slane %v380_v0, 4  ;;  %v749_v23 = vshll.u32 %v324_v58, 16  ;;  %v755_v24 = vshll.u32 %v325_v3, 16  ;;  %v404_v27 = vrot.slane %v402_v21, 4 }
  0x22   : > { %1133 = vmatmul.mubr.msk.bf16.gmra.mrb[4].mxu0 %vm464_vm0, %v1065_v12  ;;  %v407_v28 = vrot.slane %v405_v22, 5  ;;  %v400_v30 = vsel %vm1353_vm3, %v395_v17, %v399_v10  ;;  %1108 = vmatprep.mubr.msk.bf16.mxu1 %vm464_vm0, %v1042_v18  ;;  %v748_v31 = vrot.slane %v746_v20, 4  ;;  %v411_v32 = vshll.u32 %v319_v15, 16 }
  0x23   : > { %v386_v29 = vsel %vm1353_vm3, %v381_v16, %v385_v60  ;;  %1138 = vmatprep.mubr.msk.bf16.mxu0 %vm464_vm0, %v1073_v11  ;;  %v751_v21 = vrot.slane %v749_v23, 5  ;;  %v418_v22 = vrot.slane %v416_v25, 4  ;;  %v421_v39 = vrot.slane %v419_v26, 5 }
  0x24   : > { %v1043_v35 = vcombine.low %v372_v55, %v386_v29  ;;  %v1074_v36 = vcombine.low %v386_v29, %v400_v30  ;;  %v408_v37 = vor.u32 %v407_v28, %v404_v27  ;;  %v413_v38 = vrot.slane %v411_v32, 5 }
  0x25   : > { %v425_v41 = vshll.u32 %v321_v33, 16  ;;  %v432_v42 = vrot.slane %v430_v62, 4  ;;  %v435_v43 = vrot.slane %v433_v7, 5  ;;  %v439_v44 = vshll.u32 %v323_v34, 16 }
  0x26   : > { %1109 = vmatmul.mubr.msk.bf16.vlgmr.msra.gmra.mrb[0].mxu1 %vm464_vm0, %v1043_v35  ;;  %v757_v45 = vrot.slane %v755_v24, 5  ;;  %v409_v46 = vrot.slane %v408_v37, 4  ;;  %v422_v47 = vor.u32 %v421_v39, %v418_v22  ;;  %v752_v48 = vor.u32 %v751_v21, %v748_v31 }
  0x27   : > { %1117 = vmatpush3.bf16.msra.mxu1 %v1288_v2  ;;  %v427_v50 = vrot.slane %v425_v41, 5  ;;  %v436_v51 = vor.u32 %v435_v43, %v432_v42  ;;  %v441_v52 = vrot.slane %v439_v44, 5  ;;  %v1051_v59 = vcombine.low %v1330_v19, %v1303_v4 }
  0x28   : > { %v414_v25 = vsel %vm1353_vm3, %v409_v46, %v413_v38  ;;  %v423_v53 = vrot.slane %v422_v47, 4  ;;  %v753_v26 = vrot.slane %v752_v48, 4  ;;  %v1053_v62 = vcombine.low %v1314_v9, %v1321_v13 }
  0x29   : > { %v1044_v54 = vcombine.low %v400_v30, %v414_v25  ;;  %v437_v55 = vrot.slane %v436_v51, 4  ;;  %v1054_v4 = vcombine.low %v1324_v14, %v1363_v49  ;;  %v1233_v5 = vmov 0.0  }
  0x2a   : > { %1139 = vmatmul.mubr.msk.bf16.vlgmr.msra.gmra.mrb[0].mxu0 %vm464_vm0, %v1074_v36  ;;  %v428_v56 = vsel %vm1353_vm3, %v423_v53, %v427_v50  ;;  %v758_v2 = vsel %vm1353_vm3, %v753_v26, %v757_v45  ;;  %863 = vst.msk [vmem:[%s1423_s11] sm:$0x1] %vm862_vm4, %v1233_v5  ;;  %864 = vst.msk [vmem:[%s1429_s14] sm:$0x1] %vm862_vm4, %v1233_v5 }
  0x2b   : > { %1112 = vmatprep.mubr.msk.bf16.mxu1 %vm464_vm0, %v1044_v54  ;;  %v442_v57 = vsel %vm1353_vm3, %v437_v55, %v441_v52  ;;  %v1075_v58 = vcombine.low %v414_v25, %v428_v56 }
  0x2c   : > { %v1045_v60 = vcombine.low %v428_v56, %v442_v57  ;;  %v1076_v61 = vcombine.low %v442_v57, %v758_v2 }
  0x2d   : > { %1142 = vmatprep.mubr.msk.bf16.mxu0 %vm464_vm0, %v1075_v58 }
  0x2e   : > { %1113 = vmatmul.mubr.msk.bf16.gmra.mrb[4].mxu1 %vm464_vm0, %v1045_v60 }
  0x2f   : > { %1118 = vmatprep.mubr.msk.bf16.mxu1 %vm464_vm0, %v1051_v59 }
  0x32   : > { %1143 = vmatmul.mubr.msk.bf16.gmra.mrb[4].mxu0 %vm464_vm0, %v1076_v61 }
  0x36   : > { %1119 = vmatmul.mubr.msk.bf16.vlgmr.msra.gmra.mrb[0].mxu1 %vm464_vm0, %v1052_v40 }
  0x37   : > { %1122 = vmatprep.mubr.msk.bf16.mxu1 %vm464_vm0, %v1053_v62 }
  0x3e   : > { %1123 = vmatmul.mubr.msk.bf16.gmra.mrb[4].mxu1 %vm464_vm0, %v1054_v4 }
  0xfd   : > { %v1140_v6 = vpop.f32.mrb[0].mxu0 }
  0xfe   : > { %v819_v9 = vpop.f32.mrb[1].mxu0 }
  0xff   : > { %v1141_v13 = vpop.f32.mrb[2].mxu0 }
 0x100   : > { %v822_v14 = vpop.f32.mrb[3].mxu0 }
 0x105   : > { %v1144_v19 = vpop.f32.mrb[4].mxu0 }
 0x106   : > { %v835_v49 = vpop.f32.mrb[5].mxu0 }
 0x107   : > { %v1145_v63 = vpop.f32.mrb[6].mxu0 }
 0x108   : > { %v838_v0 = vpop.f32.mrb[7].mxu0 }
 0x109   : > { %v1120_v1 = vpop.f32.mrb[0].mxu1 }
 0x10a   : > { %v1146_v3 = vadd.f32 %v1140_v6, %v1120_v1  ;;  %v614_v7 = vpop.f32.mrb[1].mxu1 }
 0x10b   : > { %v1147_v8 = vadd.f32 %v819_v9, %v614_v7  ;;  %v1121_v10 = vpop.f32.mrb[2].mxu1 }
 0x10c   : > { %v1148_v11 = vadd.f32 %v1141_v13, %v1121_v10  ;;  %v617_v12 = vpop.f32.mrb[3].mxu1  ;;  %v894_v17 = vmul.f32 %v1146_v3, %v1146_v3  ;;  %v870_v28 = vsel %vm866_vm5, %v1146_v3, 0.0 }
 0x10d   : > { %v892_v15 = vmul.f32 %v1147_v8, %v1147_v8  ;;  %v1149_v16 = vadd.f32 %v822_v14, %v617_v12  ;;  %v867_v18 = vsel %vm866_vm5, %v1147_v8, 0.0  ;;  %v891_v8 = vld [vmem:[%s1429_s14] sm:$0x1] }
 0x10e   : > { %v895_v24 = vmul.f32 %v1148_v11, %v1148_v11  ;;  %v903_v36 = vsel %vm866_vm5, %v894_v17, 0.0  ;;  %v872_v21 = vsel %vm866_vm5, %v1148_v11, 0.0 }
 0x10f   : > { %v868_v20 = vsel %vm866_vm5, %v1149_v16, 0.0  ;;  %v893_v23 = vmul.f32 %v1149_v16, %v1149_v16  ;;  %v900_v29 = vsel %vm866_vm5, %v892_v15, 0.0 }
 0x110   : > { %v869_v27 = vadd.f32 %v868_v20, %v867_v18  ;;  %v905_v22 = vsel %vm866_vm5, %v895_v24, 0.0 }
 0x111   : > { %v901_v30 = vsel %vm866_vm5, %v893_v23, 0.0  ;;  %v1124_v31 = vpop.f32.mrb[4].mxu1 }
 0x112   : > { %v871_v32 = vadd.f32 %v870_v28, %v869_v27  ;;  %v902_v33 = vadd.f32 %v901_v30, %v900_v29  ;;  %v1150_v34 = vadd.f32 %v1144_v19, %v1124_v31  ;;  %v630_v35 = vpop.f32.mrb[5].mxu1 }
 0x113   : > { %v1151_v37 = vadd.f32 %v835_v49, %v630_v35  ;;  %v1125_v38 = vpop.f32.mrb[6].mxu1 }
 0x114   : > { %v904_v39 = vadd.f32 %v903_v36, %v902_v33  ;;  %v873_v41 = vadd.f32 %v872_v21, %v871_v32  ;;  %v633_v42 = vpop.f32.mrb[7].mxu1  ;;  %v1152_v45 = vadd.f32 %v1145_v63, %v1125_v38  ;;  %v898_v52 = vmul.f32 %v1150_v34, %v1150_v34  ;;  %v865_v63 = vld [vmem:[%s1423_s11] sm:$0x1] }
 0x115   : > { %v874_v43 = vsel %vm866_vm5, %v1151_v37, 0.0  ;;  %v896_v44 = vmul.f32 %v1151_v37, %v1151_v37  ;;  %v1153_v46 = vadd.f32 %v838_v0, %v633_v42  ;;  %v878_v54 = vsel %vm866_vm5, %v1150_v34, 0.0 }
 0x116   : > { %v875_v47 = vadd.f32 %v874_v43, %v873_v41  ;;  %v906_v48 = vadd.f32 %v905_v22, %v904_v39  ;;  %v899_v55 = vmul.f32 %v1152_v45, %v1152_v45  ;;  %v880_v57 = vsel %vm866_vm5, %v1152_v45, 0.0 }
 0x117   : > { %v907_v50 = vsel %vm866_vm5, %v896_v44, 0.0  ;;  %v876_v51 = vsel %vm866_vm5, %v1153_v46, 0.0  ;;  %v897_v26 = vmul.f32 %v1153_v46, %v1153_v46  ;;  %v911_v59 = vsel %vm866_vm5, %v898_v52, 0.0 }
 0x118   : > { %v908_v25 = vadd.f32 %v907_v50, %v906_v48  ;;  %v877_v53 = vadd.f32 %v876_v51, %v875_v47  ;;  %v913_v40 = vsel %vm866_vm5, %v899_v55, 0.0 }
 0x119   : > { %v909_v2 = vsel %vm866_vm5, %v897_v26, 0.0 }
 0x11a   : > { %v879_v56 = vadd.f32 %v878_v54, %v877_v53  ;;  %v910_v58 = vadd.f32 %v909_v2, %v908_v25 }
 0x11c   : > { %v881_v60 = vadd.f32 %v880_v57, %v879_v56  ;;  %v912_v61 = vadd.f32 %v911_v59, %v910_v58 }
 0x11e   : > { %v882_v62 = vrot.slane %v881_v60, 4  ;;  %v914_v4 = vadd.f32 %v913_v40, %v912_v61 }
 0x120   : > { %v883_v5 = vadd.f32 %v882_v62, %v881_v60  ;;  %v915_v6 = vrot.slane %v914_v4, 4 }
 0x122   : > { %v884_v9 = vrot.slane %v883_v5, 2  ;;  %v916_v13 = vadd.f32 %v915_v6, %v914_v4 }
 0x124   : > { %v885_v14 = vadd.f32 %v884_v9, %v883_v5  ;;  %v917_v19 = vrot.slane %v916_v13, 2 }
 0x126   : > { %v886_v49 = vrot.slane %v885_v14, 1  ;;  %v918_v0 = vadd.f32 %v917_v19, %v916_v13 }
 0x128   : > { %v887_v1 = vadd.f32 %v886_v49, %v885_v14  ;;  %v919_v3 = vrot.slane %v918_v0, 1 }
 0x12a   : > { %v888_v7 = vadd.f32 %v887_v1, %v865_v63  ;;  %v920_v10 = vadd.f32 %v919_v3, %v918_v0 }
 0x12c   : > { %890 = vst.msk [vmem:[%s1423_s11] sm:$0x1] %vm862_vm4, %v888_v7  ;;  %v921_v11 = vadd.f32 %v920_v10, %v891_v8 }
 0x12e   : > { %922 = vst.msk [vmem:[%s1429_s14] sm:$0x1] %vm862_vm4, %v921_v11 }
 0x12f PF: > { %s15_s17 = sadd.s32 1, %s1231_s17   ;;  %s1473_s15 = smov %s1227_s16 }
 0x130   : > { %p12_p5 = scmp.ge.s32.totalorder %s15_s17, 4   ;;  %s1474_s16 = smov %s1476_s18 }
 0x132   :  { %14 = sbr.rel (!%p12_p5) target bundleno = 2 (0x2), region = 84 }

</bundles_post_ra>
